<compile_context>
chip_gen: v7x
topology: tpu7x:2x2x1
jax: 0.10.0
libtpu: 0.0.40
codegen_flags: <defaults>
</compile_context>

<pallas_src>
import functools

import jax
import jax.numpy as jnp
import numpy as np
from jax.experimental import pallas as pl
from jax.experimental.pallas import tpu as pltpu


def _round_up(x, m):
    return (x + m - 1) // m * m


def _cdiv(a, b):
    return (a + b - 1) // b


# ----------------------------------------------------------------------------- kernels
def _matmul_kernel(x_ref, w_ref, y_ref):
    """(tm, Cin_p) @ (Cin_p, t_ckk) bf16 -> f32 on the MXU, stored bf16."""
    y_ref[...] = jnp.dot(x_ref[...], w_ref[...],
                         preferred_element_type=jnp.float32).astype(y_ref.dtype)


def _stats_kernel(conv_ref, psum_ref, psq_ref):
    """Per-tile per-channel sum / sum-of-squares (f32) over one (1, C8, t_hw) tile."""
    v = conv_ref[...].astype(jnp.float32)                 # (1, C8, t_hw)
    s1 = jnp.sum(v, axis=2, keepdims=True)                # (1, C8, 1)
    s2 = jnp.sum(v * v, axis=2, keepdims=True)            # (1, C8, 1)
    psum_ref[...] = jnp.broadcast_to(s1, psum_ref.shape)
    psq_ref[...] = jnp.broadcast_to(s2, psq_ref.shape)


def _bn_relu_kernel(conv_ref, scale_ref, shift_ref, out_ref):
    """relu(conv * scale + shift); per-channel scale/shift live on the sublane axis."""
    v = conv_ref[...].astype(jnp.float32)                 # (1, C8, t_hw)
    y = v * scale_ref[...] + shift_ref[...]               # (1, C8, 1) broadcasts
    out_ref[...] = jnp.maximum(y, 0.0)


# ----------------------------------------------------------------------------- wrapper
def transposed_cbr(x, weight, gamma, beta, *, stride, padding, eps=1e-5):
    """x: (N, Cin, H, W) NCHW.  weight: (Cin, Cout, K, K) (ConvTranspose2d layout)."""
    N, Cin, H, W = x.shape
    _, Cout, K, _ = weight.shape
    H_out = (H - 1) * stride - 2 * padding + K
    W_out = (W - 1) * stride - 2 * padding + K
    assert H_out > 0 and W_out > 0

    # ---------------- sweep 1: (N*H*W, Cin) @ (Cin, Cout*K*K) on the MXU -------------
    Mi = N * H * W
    # Contraction dim padded to 128 for MXU/layout friendliness; this only touches the
    # thin lhs/weight streams, never the large conv tensors.
    Cin_p = _round_up(Cin, 128)
    CKK = Cout * K * K
    CKK_p0 = _round_up(CKK, 128)
    nj = _cdiv(CKK_p0, 2048)                 # lane tiles chosen so padding stays small
    t_ckk = _round_up(_cdiv(CKK_p0, nj), 128)
    CKK_pad = nj * t_ckk

    # M tiling: large tiles (~2048 rows) to amortize grid-step overhead, but keep >= 2
    # tiles when possible so the "parallel" M axis shards across both v7x TensorCores.
    M0 = _round_up(Mi, 16)
    budget = 24 * 1024 * 1024                # headroom inside the 32 MiB scoped limit
    per_row = 2 * 2 * (Cin_p + t_ckk)        # double-buffered bf16 lhs + out rows
    tm_cap = max(256, (max(budget - 4 * Cin_p * t_ckk, 0) // per_row) // 16 * 16)
    nm = _cdiv(M0, min(2048, tm_cap))
    if nm < 2 and M0 >= 512:
        nm = 2
    tm = _round_up(_cdiv(M0, nm), 16)
    M_pad = nm * tm

    x_mat = jnp.transpose(x, (0, 2, 3, 1)).reshape(Mi, Cin).astype(jnp.bfloat16)
    x_p = jnp.zeros((M_pad, Cin_p), jnp.bfloat16).at[:Mi, :Cin].set(x_mat)
    w_mat = weight.reshape(Cin, CKK).astype(jnp.bfloat16)       # no kernel flip needed
    w_p = jnp.zeros((Cin_p, CKK_pad), jnp.bfloat16).at[:Cin, :CKK].set(w_mat)

    cparams = pltpu.CompilerParams(
        dimension_semantics=("parallel", "parallel"),
        vmem_limit_bytes=32 * 1024 * 1024,
    )

    y = pl.pallas_call(
        _matmul_kernel,
        out_shape=jax.ShapeDtypeStruct((M_pad, CKK_pad), jnp.bfloat16),
        grid_spec=pltpu.PrefetchScalarGridSpec(
            num_scalar_prefetch=0,
            grid=(nm, nj),
            in_specs=[
                pl.BlockSpec((tm, Cin_p), lambda m, j: (m, 0)),
                # With nj == 1 (typical) the block index is constant -> weight is
                # DMA'd exactly once and stays resident across all M tiles.
                pl.BlockSpec((Cin_p, t_ckk), lambda m, j: (0, j)),
            ],
            out_specs=pl.BlockSpec((tm, t_ckk), lambda m, j: (m, j)),
        ),
        compiler_params=cparams,
    )(x_p, w_p)

    # -------- glue (thin JAX): col2im overlap-add -> conv, NCHW-flat, bf16 ----------
    s = stride
    Hb, Wb = (H - 1) * s + K, (W - 1) * s + K
    contrib = y[:Mi, :CKK].astype(jnp.float32).reshape(N, H, W, Cout, K, K)
    contrib = jnp.transpose(contrib, (0, 3, 4, 5, 1, 2))        # (N, Cout, K, K, H, W)
    buf = jnp.zeros((N, Cout, Hb, Wb), jnp.float32)
    for kh in range(K):
        for kw in range(K):
            buf = buf.at[:, :, kh:kh + (H - 1) * s + 1:s,
                         kw:kw + (W - 1) * s + 1:s].add(contrib[:, :, kh, kw])
    conv = buf[:, :, padding:padding + H_out, padding:padding + W_out]

    # ------------ layout for the BN sweeps: (N, C8, HWp), channels on sublanes -------
    HW = H_out * W_out
    C8 = _round_up(Cout, 8)
    HW0 = _round_up(HW, 128)
    hw_budget = max(512, (2 * 1024 * 1024) // (4 * C8))   # ~2 MiB f32 per tile
    hw_target = max(128, min(4096, hw_budget // 128 * 128))
    n_hw = _cdiv(HW0, hw_target)
    t_hw = _round_up(_cdiv(HW0, n_hw), 128)
    HWp = n_hw * t_hw

    conv_flat = conv.reshape(N, Cout, HW).astype(jnp.bfloat16)
    if C8 == Cout and HWp == HW:
        conv_p = conv_flat
    else:
        conv_p = jnp.zeros((N, C8, HWp), jnp.bfloat16).at[:, :Cout, :HW].set(conv_flat)

    # ---------------- sweep 2: per-tile BN partial sums (exact across tiles) ---------
    psum, psq = pl.pallas_call(
        _stats_kernel,
        out_shape=(
            jax.ShapeDtypeStruct((N * n_hw, C8, 128), jnp.float32),
            jax.ShapeDtypeStruct((N * n_hw, C8, 128), jnp.float32),
        ),
        grid_spec=pltpu.PrefetchScalarGridSpec(
            num_scalar_prefetch=0,
            grid=(N, n_hw),
            in_specs=[pl.BlockSpec((1, C8, t_hw), lambda n, hw: (n, 0, hw))],
            out_specs=[
                pl.BlockSpec((1, C8, 128), lambda n, hw: (n * n_hw + hw, 0, 0)),
                pl.BlockSpec((1, C8, 128), lambda n, hw: (n * n_hw + hw, 0, 0)),
            ],
        ),
        compiler_params=cparams,
    )(conv_p)

    # ------------- tiny cross-tile reduction -> global BN mean/var (biased) ----------
    # Padded channels / HW columns are exactly zero, so they add nothing to the sums.
    s1 = psum[:, :Cout, 0].sum(axis=0)
    s2 = psq[:, :Cout, 0].sum(axis=0)
    count = jnp.float32(N * HW)
    mean = s1 / count
    var = jnp.maximum(s2 / count - mean * mean, 0.0)
    inv = jax.lax.rsqrt(var + eps)
    scale = gamma.astype(jnp.float32) * inv
    shift = beta.astype(jnp.float32) - mean * scale
    scale_p = jnp.zeros((1, C8, 1), jnp.float32).at[0, :Cout, 0].set(scale)
    shift_p = jnp.zeros((1, C8, 1), jnp.float32).at[0, :Cout, 0].set(shift)

    # ---------------- sweep 3: normalize + ReLU, lane-dense, native NCHW layout ------
    out_p = pl.pallas_call(
        _bn_relu_kernel,
        out_shape=jax.ShapeDtypeStruct((N, C8, HWp), jnp.float32),
        grid_spec=pltpu.PrefetchScalarGridSpec(
            num_scalar_prefetch=0,
            grid=(N, n_hw),
            in_specs=[
                pl.BlockSpec((1, C8, t_hw), lambda n, hw: (n, 0, hw)),
                pl.BlockSpec((1, C8, 1), lambda n, hw: (0, 0, 0)),
                pl.BlockSpec((1, C8, 1), lambda n, hw: (0, 0, 0)),
            ],
            out_specs=pl.BlockSpec((1, C8, t_hw), lambda n, hw: (n, 0, hw)),
        ),
        compiler_params=cparams,
    )(conv_p, scale_p, shift_p)

    # Channels-major layout means this is already NCHW: cheap slice + reshape only.
    return out_p[:, :Cout, :HW].reshape(N, Cout, H_out, W_out)


# ----------------------------------------------------------------------------- reference
def reference(x, weight, gamma, beta, *, stride, padding, eps=1e-5):
    """Pure-JAX f32 reference matching PyTorch ConvTranspose2d + BatchNorm2d(train) + ReLU."""
    K = weight.shape[2]
    ph = K - 1 - padding
    w_flip = weight[:, :, ::-1, ::-1]
    conv = jax.lax.conv_general_dilated(
        x.astype(jnp.float32), w_flip.astype(jnp.float32),
        window_strides=(1, 1), padding=[(ph, ph), (ph, ph)],
        lhs_dilation=(stride, stride),
        dimension_numbers=("NCHW", "IOHW", "NCHW"))
    mean = conv.mean(axis=(0, 2, 3), keepdims=True)
    var = ((conv - mean) ** 2).mean(axis=(0, 2, 3), keepdims=True)
    y = (conv - mean) * jax.lax.rsqrt(var + eps)
    y = y * gamma.reshape(1, -1, 1, 1) + beta.reshape(1, -1, 1, 1)
    return jnp.maximum(y, 0.0)


if __name__ == "__main__":
    # Typical DCGAN up-block: in_dim=4, out_dim=8, k=4, s=2, p=1
    in_dim, out_dim, kernel, stride, padding = 4, 8, 4, 2, 1
    N, H, W = 2, 16, 16

    key = jax.random.PRNGKey(0)
    kx, kw, kg, kb = jax.random.split(key, 4)
    x = jax.random.normal(kx, (N, in_dim, H, W), jnp.float32)
    # ConvTranspose2d weight shape: (in_channels, out_channels, kH, kW), bias=False
    weight = jax.random.normal(kw, (in_dim, out_dim, kernel, kernel), jnp.float32) * 0.1
    gamma = 1.0 + 0.1 * jax.random.normal(kg, (out_dim,), jnp.float32)
    beta = 0.1 * jax.random.normal(kb, (out_dim,), jnp.float32)

    fn = jax.jit(functools.partial(transposed_cbr, stride=stride, padding=padding))
    out = jax.block_until_ready(fn(x, weight, gamma, beta))

    ref = jax.block_until_ready(
        reference(x, weight, gamma, beta, stride=stride, padding=padding))

    H_out = (H - 1) * stride - 2 * padding + kernel
    W_out = (W - 1) * stride - 2 * padding + kernel
    assert out.shape == (N, out_dim, H_out, W_out), out.shape
    # bf16 MXU operands + bf16 intermediates vs f32 reference -> loosened tolerance.
    np.testing.assert_allclose(np.asarray(out), np.asarray(ref), rtol=2e-2, atol=2e-2)
    print("KERNEL_OK")
</pallas_src>

<mosaic_0001>
module attributes {stable_mosaic.version = 11 : i64} {
  func.func @_matmul_kernel(%arg0: i32, %arg1: i32, %arg2: memref<256x128xbf16, #tpu.memory_space<vmem>>, %arg3: memref<128x128xbf16, #tpu.memory_space<vmem>>, %arg4: memref<256x128xbf16, #tpu.memory_space<vmem>>) attributes {dimension_semantics = [#tpu.dimension_semantics<parallel>, #tpu.dimension_semantics<parallel>], iteration_bounds = array<i64: 2, 1>, scalar_prefetch = 0 : i64, scratch_operands = 0 : i64, tpu.core_type = #tpu.core_type<tc>, window_params = [{transform_indices = @transform_0, window_bounds = array<i64: 256, 128>}, {transform_indices = @transform_1, window_bounds = array<i64: 128, 128>}, {transform_indices = @transform_2, window_bounds = array<i64: 256, 128>}]} {
    %c0 = arith.constant 0 : index
    %c0_0 = arith.constant 0 : index
    %0 = vector.load %arg2[%c0, %c0_0] : memref<256x128xbf16, #tpu.memory_space<vmem>>, vector<256x128xbf16>
    %c0_1 = arith.constant 0 : index
    %c0_2 = arith.constant 0 : index
    %1 = vector.load %arg3[%c0_1, %c0_2] : memref<128x128xbf16, #tpu.memory_space<vmem>>, vector<128x128xbf16>
    %cst = arith.constant dense<0.000000e+00> : vector<256x128xf32>
    %2 = tpu.matmul %0, %1, %cst {dimension_numbers = #tpu.dot_dimension_numbers<[1], [0], [0], [1], [0, 0, 1, 1], [], []>} : vector<256x128xbf16>, vector<128x128xbf16>, vector<256x128xf32> -> vector<256x128xf32>
    %3 = arith.truncf %2 : vector<256x128xf32> to vector<256x128xbf16>
    %c0_3 = arith.constant 0 : index
    %c0_4 = arith.constant 0 : index
    %4 = vector.load %arg4[%c0_3, %c0_4] : memref<256x128xbf16, #tpu.memory_space<vmem>>, vector<256x128xbf16>
    tpu.vector_store %arg4[%c0_3, %c0_4], %3 {strides = array<i32>} : memref<256x128xbf16, #tpu.memory_space<vmem>>, vector<256x128xbf16>,
    return
  }
  func.func @transform_0(%arg0: i32, %arg1: i32) -> (i32, i32) {
    %c0_i32 = arith.constant 0 : i32
    %c0_i32_0 = arith.constant 0 : i32
    return %arg0, %c0_i32 : i32, i32
  }
  func.func @transform_1(%arg0: i32, %arg1: i32) -> (i32, i32) {
    %c0_i32 = arith.constant 0 : i32
    %c0_i32_0 = arith.constant 0 : i32
    return %c0_i32, %arg1 : i32, i32
  }
  func.func @transform_2(%arg0: i32, %arg1: i32) -> (i32, i32) {
    %c0_i32 = arith.constant 0 : i32
    return %arg0, %arg1 : i32, i32
  }
}

module attributes {stable_mosaic.version = 11 : i64} {
  func.func @_stats_kernel(%arg0: i32, %arg1: i32, %arg2: memref<1x8x1024xbf16, #tpu.memory_space<vmem>>, %arg3: memref<1x8x128xf32, #tpu.memory_space<vmem>>, %arg4: memref<1x8x128xf32, #tpu.memory_space<vmem>>) attributes {dimension_semantics = [#tpu.dimension_semantics<parallel>, #tpu.dimension_semantics<parallel>], iteration_bounds = array<i64: 2, 1>, scalar_prefetch = 0 : i64, scratch_operands = 0 : i64, tpu.core_type = #tpu.core_type<tc>, window_params = [{transform_indices = @transform_0, window_bounds = array<i64: 1, 8, 1024>}, {transform_indices = @transform_1, window_bounds = array<i64: 1, 8, 128>}, {transform_indices = @transform_2, window_bounds = array<i64: 1, 8, 128>}]} {
    %c0 = arith.constant 0 : index
    %c0_0 = arith.constant 0 : index
    %c0_1 = arith.constant 0 : index
    %0 = vector.load %arg2[%c0, %c0_0, %c0_1] : memref<1x8x1024xbf16, #tpu.memory_space<vmem>>, vector<1x8x1024xbf16>
    %1 = arith.extf %0 : vector<1x8x1024xbf16> to vector<1x8x1024xf32>
    %cst = arith.constant dense<0.000000e+00> : vector<1x8xf32>
    %2 = vector.multi_reduction <add>, %1, %cst [2] : vector<1x8x1024xf32> to vector<1x8xf32>
    %3 = vector.shape_cast %2 : vector<1x8xf32> to vector<1x8x1xf32>
    %4 = arith.mulf %1, %1 : vector<1x8x1024xf32>
    %cst_2 = arith.constant dense<0.000000e+00> : vector<1x8xf32>
    %5 = vector.multi_reduction <add>, %4, %cst_2 [2] : vector<1x8x1024xf32> to vector<1x8xf32>
    %6 = vector.shape_cast %5 : vector<1x8xf32> to vector<1x8x1xf32>
    %7 = vector.shape_cast %3 : vector<1x8x1xf32> to vector<1x8x1xf32>
    %8 = vector.broadcast %7 : vector<1x8x1xf32> to vector<1x8x128xf32>
    %c0_3 = arith.constant 0 : index
    %c0_4 = arith.constant 0 : index
    %c0_5 = arith.constant 0 : index
    %9 = vector.load %arg3[%c0_3, %c0_4, %c0_5] : memref<1x8x128xf32, #tpu.memory_space<vmem>>, vector<1x8x128xf32>
    tpu.vector_store %arg3[%c0_3, %c0_4, %c0_5], %8 {strides = array<i32>} : memref<1x8x128xf32, #tpu.memory_space<vmem>>, vector<1x8x128xf32>,
    %10 = vector.shape_cast %6 : vector<1x8x1xf32> to vector<1x8x1xf32>
    %11 = vector.broadcast %10 : vector<1x8x1xf32> to vector<1x8x128xf32>
    %c0_6 = arith.constant 0 : index
    %c0_7 = arith.constant 0 : index
    %c0_8 = arith.constant 0 : index
    %12 = vector.load %arg4[%c0_6, %c0_7, %c0_8] : memref<1x8x128xf32, #tpu.memory_space<vmem>>, vector<1x8x128xf32>
    tpu.vector_store %arg4[%c0_6, %c0_7, %c0_8], %11 {strides = array<i32>} : memref<1x8x128xf32, #tpu.memory_space<vmem>>, vector<1x8x128xf32>,
    return
  }
  func.func @transform_0(%arg0: i32, %arg1: i32) -> (i32, i32, i32) {
    %c0_i32 = arith.constant 0 : i32
    %c0_i32_0 = arith.constant 0 : i32
    return %arg0, %c0_i32, %arg1 : i32, i32, i32
  }
  func.func @transform_1(%arg0: i32, %arg1: i32) -> (i32, i32, i32) {
    %c1_i32 = arith.constant 1 : i32
    %0 = arith.muli %arg0, %c1_i32 : i32
    %1 = arith.addi %0, %arg1 : i32
    %c0_i32 = arith.constant 0 : i32
    %c0_i32_0 = arith.constant 0 : i32
    %c0_i32_1 = arith.constant 0 : i32
    return %1, %c0_i32, %c0_i32_0 : i32, i32, i32
  }
  func.func @transform_2(%arg0: i32, %arg1: i32) -> (i32, i32, i32) {
    %c1_i32 = arith.constant 1 : i32
    %0 = arith.muli %arg0, %c1_i32 : i32
    %1 = arith.addi %0, %arg1 : i32
    %c0_i32 = arith.constant 0 : i32
    %c0_i32_0 = arith.constant 0 : i32
    %c0_i32_1 = arith.constant 0 : i32
    return %1, %c0_i32, %c0_i32_0 : i32, i32, i32
  }
}

module attributes {stable_mosaic.version = 11 : i64} {
  func.func @_bn_relu_kernel(%arg0: i32, %arg1: i32, %arg2: memref<1x8x1024xbf16, #tpu.memory_space<vmem>>, %arg3: memref<1x8x1xf32, #tpu.memory_space<vmem>>, %arg4: memref<1x8x1xf32, #tpu.memory_space<vmem>>, %arg5: memref<1x8x1024xf32, #tpu.memory_space<vmem>>) attributes {dimension_semantics = [#tpu.dimension_semantics<parallel>, #tpu.dimension_semantics<parallel>], iteration_bounds = array<i64: 2, 1>, scalar_prefetch = 0 : i64, scratch_operands = 0 : i64, tpu.core_type = #tpu.core_type<tc>, window_params = [{transform_indices = @transform_0, window_bounds = array<i64: 1, 8, 1024>}, {pipeline_mode = #tpu.pipeline_mode<synchronous>, transform_indices = @transform_1, window_bounds = array<i64: 1, 8, 1>}, {pipeline_mode = #tpu.pipeline_mode<synchronous>, transform_indices = @transform_2, window_bounds = array<i64: 1, 8, 1>}, {transform_indices = @transform_3, window_bounds = array<i64: 1, 8, 1024>}]} {
    %c0 = arith.constant 0 : index
    %c0_0 = arith.constant 0 : index
    %c0_1 = arith.constant 0 : index
    %0 = vector.load %arg2[%c0, %c0_0, %c0_1] : memref<1x8x1024xbf16, #tpu.memory_space<vmem>>, vector<1x8x1024xbf16>
    %1 = arith.extf %0 : vector<1x8x1024xbf16> to vector<1x8x1024xf32>
    %c0_2 = arith.constant 0 : index
    %c0_3 = arith.constant 0 : index
    %c0_4 = arith.constant 0 : index
    %2 = vector.load %arg3[%c0_2, %c0_3, %c0_4] : memref<1x8x1xf32, #tpu.memory_space<vmem>>, vector<1x8x1xf32>
    %3 = vector.broadcast %2 : vector<1x8x1xf32> to vector<1x8x1024xf32>
    %4 = arith.mulf %1, %3 : vector<1x8x1024xf32>
    %c0_5 = arith.constant 0 : index
    %c0_6 = arith.constant 0 : index
    %c0_7 = arith.constant 0 : index
    %5 = vector.load %arg4[%c0_5, %c0_6, %c0_7] : memref<1x8x1xf32, #tpu.memory_space<vmem>>, vector<1x8x1xf32>
    %6 = vector.broadcast %5 : vector<1x8x1xf32> to vector<1x8x1024xf32>
    %7 = arith.addf %4, %6 : vector<1x8x1024xf32>
    %cst = arith.constant 0.000000e+00 : f32
    %8 = vector.broadcast %cst : f32 to vector<1x8x1024xf32>
    %9 = arith.maximumf %7, %8 : vector<1x8x1024xf32>
    %c0_8 = arith.constant 0 : index
    %c0_9 = arith.constant 0 : index
    %c0_10 = arith.constant 0 : index
    %10 = vector.load %arg5[%c0_8, %c0_9, %c0_10] : memref<1x8x1024xf32, #tpu.memory_space<vmem>>, vector<1x8x1024xf32>
    tpu.vector_store %arg5[%c0_8, %c0_9, %c0_10], %9 {strides = array<i32>} : memref<1x8x1024xf32, #tpu.memory_space<vmem>>, vector<1x8x1024xf32>,
    return
  }
  func.func @transform_0(%arg0: i32, %arg1: i32) -> (i32, i32, i32) {
    %c0_i32 = arith.constant 0 : i32
    %c0_i32_0 = arith.constant 0 : i32
    return %arg0, %c0_i32, %arg1 : i32, i32, i32
  }
  func.func @transform_1(%arg0: i32, %arg1: i32) -> (i32, i32, i32) {
    %c0_i32 = arith.constant 0 : i32
    %c0_i32_0 = arith.constant 0 : i32
    %c0_i32_1 = arith.constant 0 : i32
    %c0_i32_2 = arith.constant 0 : i32
    return %c0_i32, %c0_i32_0, %c0_i32_1 : i32, i32, i32
  }
  func.func @transform_2(%arg0: i32, %arg1: i32) -> (i32, i32, i32) {
    %c0_i32 = arith.constant 0 : i32
    %c0_i32_0 = arith.constant 0 : i32
    %c0_i32_1 = arith.constant 0 : i32
    %c0_i32_2 = arith.constant 0 : i32
    return %c0_i32, %c0_i32_0, %c0_i32_1 : i32, i32, i32
  }
  func.func @transform_3(%arg0: i32, %arg1: i32) -> (i32, i32, i32) {
    %c0_i32 = arith.constant 0 : i32
    %c0_i32_0 = arith.constant 0 : i32
    return %arg0, %c0_i32, %arg1 : i32, i32, i32
  }
}

</mosaic_0001>

<bundles_post_ra>
// kernel: transposed_cbr.3
= control target key start
LH: loop header
LB: loop body
LE: loop exit
PB: predicated region body
PF: predicated region fallthrough
CT: control target
= control target key end

     0   :  { %s1158_s9 = smov 0   ;;  %s1160_s10 = smov 0   ;;  %s1258_s0 = inlined_call_operand.vmem [shape: bf16[512,128], index: 0, kind: input, shape index: {}]   ;;  %s1259_s1 = inlined_call_operand.vmem [shape: bf16[128,128], index: 1, kind: input, shape index: {}]   ;;  %s1260_s2 = inlined_call_operand.vmem [shape: bf16[512,128], index: 2, kind: output, shape index: {}]  }
   0x1   :  { %s1162_s11 = smov 0  }
   0x2 LB: > { %s24_s12 = sadd.s32 1, %s1137_s10  ;;  %p793_p0 = scmp.ge.s32.totalorder %s1141_s11, 1  ;;  %s1141_s11 = sphi %s1162_s11, %s12_s11   ;;  %s1137_s10 = sphi %s1160_s10, %s1262_s10   ;;  %s1133_s9 = sphi %s1158_s9, %s1261_s9  }
   0x3   : > { %p26_p1 = scmp.ge.s32.totalorder %s24_s12, 2  ;;  %p136_p2 = scmp.lt.s32.totalorder %s1141_s11, 3 }
   0x5   : > { %s1264_s12 = smov (%p26_p1, %s24_s12), 0  ;;  %p137_p3 = pnand %p793_p0, %p136_p2 }
   0x6   : > { %v1095_v0 = vld [vmem:[%s1259_s1] sm:$0xff] (!%p137_p3)   ;;  %s794_s15 = sshll.u32 (!%p137_p3), %s1133_s9, 5  ;;  %v1096_v1 = vld [vmem:[%s1259_s1 + $0x8] sm:$0xff] (!%p137_p3)   ;;  %v1097_v2 = vld [vmem:[%s1259_s1 + $0x10] sm:$0xff] (!%p137_p3)  }
   0x7   : > { %140 = sbr.rel (%p137_p3) target bundleno = 281 (0x119), region = 28  ;;  %p166_p4 = scmp.lt.s32.totalorder (!%p137_p3), %s794_s15, 63  ;;  %1007 = vmatprep.subr.bf16.mxu0 (!%p137_p3), %v1095_v0  ;;  %1055 = vmatprep.subr.bf16.mxu1 (!%p137_p3), %v1095_v0  ;;  %v1098_v3 = vld [vmem:[%s1259_s1 + $0x18] sm:$0xff] (!%p137_p3)   ;;  %v1099_v6 = vld [vmem:[%s1259_s1 + $0x20] sm:$0xff] (!%p137_p3)   ;;  %v1100_v7 = vld [vmem:[%s1259_s1 + $0x28] sm:$0xff] (!%p137_p3)  }
   0x8   : > { %1008 = vmatpush3.bf16.msra.mxu0 (!%p137_p3), %v1095_v0  ;;  %1063 = vmatpush3.bf16.msra.mxu1 (!%p137_p3), %v1095_v0  ;;  %v1101_v8 = vld [vmem:[%s1259_s1 + $0x30] sm:$0xff] (!%p137_p3)   ;;  %v1102_v9 = vld [vmem:[%s1259_s1 + $0x38] sm:$0xff] (!%p137_p3)  }
   0x9   : > { %1009 = vmatprep.subr.bf16.mxu0 (!%p137_p3), %v1096_v1  ;;  %1056 = vmatprep.subr.bf16.mxu1 (!%p137_p3), %v1096_v1 }
   0xc   : > { %1010 = vmatpush3.bf16.msra.mxu0 (!%p137_p3), %v1096_v1  ;;  %1064 = vmatpush3.bf16.msra.mxu1 (!%p137_p3), %v1096_v1 }
   0xd   : > { %1011 = vmatprep.subr.bf16.mxu0 (!%p137_p3), %v1097_v2  ;;  %1057 = vmatprep.subr.bf16.mxu1 (!%p137_p3), %v1097_v2 }
   0xe   : > { %s1266_s15 = smov (!%p166_p4, %s794_s15), 63 }
   0xf   : > { %s795_s20 = sshll.u32 %s1266_s15, 2 }
  0x10   : > { %s1193_s23 = scalar_lea.vmem %s1258_s0, %s795_s20  ;;  %1012 = vmatpush3.bf16.msra.mxu0 %v1097_v2  ;;  %1065 = vmatpush3.bf16.msra.mxu1 %v1097_v2  ;;  %s1231_s8 = scalar_lea.vmem %s1260_s2, %s795_s20 }
  0x11   : > { %v1103_v4 = vld [vmem:[%s1193_s23] sm:$0xff]   ;;  %1013 = vmatprep.subr.bf16.mxu0 %v1098_v3  ;;  %1058 = vmatprep.subr.bf16.mxu1 %v1098_v3  ;;  %v1105_v10 = vld [vmem:[%s1193_s23 + $0x8] sm:$0xff]   ;;  %v1107_v12 = vld [vmem:[%s1193_s23 + $0x10] sm:$0xff]  }
  0x12   : > { %v1104_v5 = vld [vmem:[%s1193_s23 + $0x40] sm:$0xff]   ;;  %1023 = vmatprep.mubr.bf16.mxu0 %v1103_v4  ;;  %v1106_v11 = vld [vmem:[%s1193_s23 + $0x48] sm:$0xff]   ;;  %v1108_v13 = vld [vmem:[%s1193_s23 + $0x50] sm:$0xff]  }
  0x13   : > { %1039 = vmatprep.mubr.bf16.mxu1 %v1104_v5  ;;  %v1109_v14 = vld [vmem:[%s1193_s23 + $0x18] sm:$0xff]   ;;  %v1111_v16 = vld [vmem:[%s1193_s23 + $0x20] sm:$0xff]   ;;  %v1113_v18 = vld [vmem:[%s1193_s23 + $0x28] sm:$0xff]  }
  0x14   : > { %1014 = vmatpush3.bf16.msra.mxu0 %v1098_v3  ;;  %1066 = vmatpush3.bf16.msra.mxu1 %v1098_v3  ;;  %v1110_v15 = vld [vmem:[%s1193_s23 + $0x58] sm:$0xff]   ;;  %v1112_v17 = vld [vmem:[%s1193_s23 + $0x60] sm:$0xff]   ;;  %v1114_v19 = vld [vmem:[%s1193_s23 + $0x68] sm:$0xff]  }
  0x15   : > { %1015 = vmatprep.subr.bf16.mxu0 %v1099_v6  ;;  %1059 = vmatprep.subr.bf16.mxu1 %v1099_v6  ;;  %v1115_v20 = vld [vmem:[%s1193_s23 + $0x30] sm:$0xff]   ;;  %v1117_v22 = vld [vmem:[%s1193_s23 + $0x38] sm:$0xff]  }
  0x16   : > { %v1116_v21 = vld [vmem:[%s1193_s23 + $0x70] sm:$0xff]   ;;  %v1118_v23 = vld [vmem:[%s1193_s23 + $0x78] sm:$0xff]  }
  0x18   : > { %1016 = vmatpush3.bf16.msra.mxu0 %v1099_v6  ;;  %1067 = vmatpush3.bf16.msra.mxu1 %v1099_v6 }
  0x19   : > { %1017 = vmatprep.subr.bf16.mxu0 %v1100_v7  ;;  %1060 = vmatprep.subr.bf16.mxu1 %v1100_v7 }
  0x1c   : > { %1018 = vmatpush3.bf16.msra.mxu0 %v1100_v7  ;;  %1068 = vmatpush3.bf16.msra.mxu1 %v1100_v7 }
  0x1d   : > { %1019 = vmatprep.subr.bf16.mxu0 %v1101_v8  ;;  %1061 = vmatprep.subr.bf16.mxu1 %v1101_v8 }
  0x20   : > { %1020 = vmatpush3.bf16.msra.mxu0 %v1101_v8  ;;  %1069 = vmatpush3.bf16.msra.mxu1 %v1101_v8 }
  0x21   : > { %1021 = vmatprep.subr.bf16.mxu0 %v1102_v9  ;;  %1062 = vmatprep.subr.bf16.mxu1 %v1102_v9 }
  0x24   : > { %1022 = vmatpush3.bf16.msra.mxu0 %v1102_v9  ;;  %1070 = vmatpush3.bf16.msra.mxu1 %v1102_v9 }
  0x27   : > { %1024 = vmatmul.mubr.bf16.vlgmr.msra.gmra.mrb[0].mxu0 %v1105_v10  ;;  %1040 = vmatmul.mubr.bf16.vlgmr.msra.gmra.mrb[0].mxu1 %v1106_v11 }
  0x28   : > { %1027 = vmatprep.mubr.bf16.mxu0 %v1107_v12  ;;  %1043 = vmatprep.mubr.bf16.mxu1 %v1108_v13 }
  0x2f   : > { %1028 = vmatmul.mubr.bf16.gmra.mrb[4].mxu0 %v1109_v14  ;;  %1044 = vmatmul.mubr.bf16.gmra.mrb[4].mxu1 %v1110_v15 }
  0x30   : > { %1031 = vmatprep.mubr.bf16.mxu0 %v1111_v16  ;;  %1047 = vmatprep.mubr.bf16.mxu1 %v1112_v17 }
  0x37   : > { %1032 = vmatmul.mubr.bf16.gmra.mrb[8].mxu0 %v1113_v18  ;;  %1048 = vmatmul.mubr.bf16.gmra.mrb[8].mxu1 %v1114_v19 }
  0x38   : > { %1035 = vmatprep.mubr.bf16.mxu0 %v1115_v20  ;;  %1051 = vmatprep.mubr.bf16.mxu1 %v1116_v21 }
  0x3f   : > { %1036 = vmatmul.mubr.bf16.gmra.mrb[12].mxu0 %v1117_v22  ;;  %1052 = vmatmul.mubr.bf16.gmra.mrb[12].mxu1 %v1118_v23 }
  0xfa   : > { %v1025_v24 = vpop.f32.mrb[0].mxu0  ;;  %v1041_v25 = vpop.f32.mrb[0].mxu1 }
  0xfb   : > { %v411_v26 = vpop.f32.mrb[1].mxu0  ;;  %v475_v27 = vpop.f32.mrb[1].mxu1 }
  0xfc   : > { %v1026_v28 = vpop.f32.mrb[2].mxu0  ;;  %v1042_v29 = vpop.f32.mrb[2].mxu1 }
  0xfd   : > { %v896_v30 = vpack.c.bf16 %v1026_v28, %v1025_v24  ;;  %v936_v31 = vpack.c.bf16 %v1042_v29, %v1041_v25  ;;  %v414_v32 = vpop.f32.mrb[3].mxu0  ;;  %v478_v33 = vpop.f32.mrb[3].mxu1 }
  0xfe   : > { %v891_v34 = vpack.c.bf16 %v414_v32, %v411_v26  ;;  %v931_v35 = vpack.c.bf16 %v478_v33, %v475_v27 }
  0xff   : > { %968 = vst [vmem:[%s1231_s8 + $0x8] sm:$0xff] %v896_v30   ;;  %976 = vst [vmem:[%s1231_s8 + $0x48] sm:$0xff] %v936_v31  }
 0x100   : > { %892 = vst [vmem:[%s1231_s8] sm:$0xff] %v891_v34   ;;  %975 = vst [vmem:[%s1231_s8 + $0x40] sm:$0xff] %v931_v35  }
 0x102   : > { %v1029_v36 = vpop.f32.mrb[4].mxu0  ;;  %v1045_v37 = vpop.f32.mrb[4].mxu1 }
 0x103   : > { %v427_v38 = vpop.f32.mrb[5].mxu0  ;;  %v491_v39 = vpop.f32.mrb[5].mxu1 }
 0x104   : > { %v1030_v40 = vpop.f32.mrb[6].mxu0  ;;  %v1046_v41 = vpop.f32.mrb[6].mxu1 }
 0x105   : > { %v906_v42 = vpack.c.bf16 %v1030_v40, %v1029_v36  ;;  %v946_v43 = vpack.c.bf16 %v1046_v41, %v1045_v37  ;;  %v430_v44 = vpop.f32.mrb[7].mxu0  ;;  %v494_v45 = vpop.f32.mrb[7].mxu1 }
 0x106   : > { %v901_v46 = vpack.c.bf16 %v430_v44, %v427_v38  ;;  %v941_v47 = vpack.c.bf16 %v494_v45, %v491_v39 }
 0x107   : > { %970 = vst [vmem:[%s1231_s8 + $0x18] sm:$0xff] %v906_v42   ;;  %978 = vst [vmem:[%s1231_s8 + $0x58] sm:$0xff] %v946_v43  }
 0x108   : > { %969 = vst [vmem:[%s1231_s8 + $0x10] sm:$0xff] %v901_v46   ;;  %977 = vst [vmem:[%s1231_s8 + $0x50] sm:$0xff] %v941_v47  }
 0x10a   : > { %v1033_v48 = vpop.f32.mrb[8].mxu0  ;;  %v1049_v49 = vpop.f32.mrb[8].mxu1 }
 0x10b   : > { %v443_v50 = vpop.f32.mrb[9].mxu0  ;;  %v507_v51 = vpop.f32.mrb[9].mxu1 }
 0x10c   : > { %v1034_v52 = vpop.f32.mrb[10].mxu0  ;;  %v1050_v53 = vpop.f32.mrb[10].mxu1 }
 0x10d   : > { %v916_v54 = vpack.c.bf16 %v1034_v52, %v1033_v48  ;;  %v956_v55 = vpack.c.bf16 %v1050_v53, %v1049_v49  ;;  %v446_v56 = vpop.f32.mrb[11].mxu0  ;;  %v510_v57 = vpop.f32.mrb[11].mxu1 }
 0x10e   : > { %v911_v58 = vpack.c.bf16 %v446_v56, %v443_v50  ;;  %v951_v59 = vpack.c.bf16 %v510_v57, %v507_v51 }
 0x10f   : > { %972 = vst [vmem:[%s1231_s8 + $0x28] sm:$0xff] %v916_v54   ;;  %980 = vst [vmem:[%s1231_s8 + $0x68] sm:$0xff] %v956_v55  }
 0x110   : > { %971 = vst [vmem:[%s1231_s8 + $0x20] sm:$0xff] %v911_v58   ;;  %979 = vst [vmem:[%s1231_s8 + $0x60] sm:$0xff] %v951_v59  }
 0x112   : > { %v1037_v60 = vpop.f32.mrb[12].mxu0  ;;  %v1053_v61 = vpop.f32.mrb[12].mxu1 }
 0x113   : > { %v459_v62 = vpop.f32.mrb[13].mxu0  ;;  %v523_v63 = vpop.f32.mrb[13].mxu1 }
 0x114   : > { %v1038_v0 = vpop.f32.mrb[14].mxu0  ;;  %v1054_v1 = vpop.f32.mrb[14].mxu1 }
 0x115   : > { %v926_v2 = vpack.c.bf16 %v1038_v0, %v1037_v60  ;;  %v966_v3 = vpack.c.bf16 %v1054_v1, %v1053_v61  ;;  %v462_v4 = vpop.f32.mrb[15].mxu0  ;;  %v526_v5 = vpop.f32.mrb[15].mxu1 }
 0x116   : > { %v921_v6 = vpack.c.bf16 %v462_v4, %v459_v62  ;;  %v961_v7 = vpack.c.bf16 %v526_v5, %v523_v63 }
 0x117   : > { %974 = vst [vmem:[%s1231_s8 + $0x38] sm:$0xff] %v926_v2   ;;  %982 = vst [vmem:[%s1231_s8 + $0x78] sm:$0xff] %v966_v3  }
 0x118   : > { %973 = vst [vmem:[%s1231_s8 + $0x30] sm:$0xff] %v921_v6   ;;  %981 = vst [vmem:[%s1231_s8 + $0x70] sm:$0xff] %v961_v7  }
 0x119 PF: > { %s12_s11 = sadd.s32 1, %s1141_s11   ;;  %s1261_s9 = smov %s1137_s10 }
 0x11a   : > { %p9_p5 = scmp.ge.s32.totalorder %s12_s11, 4   ;;  %s1262_s10 = smov %s1264_s12 }
 0x11c   :  { %11 = sbr.rel (!%p9_p5) target bundleno = 2 (0x2), region = 61 }

// kernel: transposed_cbr.4
= control target key start
LH: loop header
LB: loop body
LE: loop exit
PB: predicated region body
PF: predicated region fallthrough
CT: control target
= control target key end

     0   :  { %s411_s9 = smov 0   ;;  %s413_s10 = smov 0   ;;  %s451_s0 = inlined_call_operand.vmem [shape: bf16[2,8,1024], index: 0, kind: input, shape index: {}]   ;;  %s452_s1 = inlined_call_operand.vmem [shape: f32[2,8,128], index: 1, kind: output, shape index: {0}]   ;;  %s453_s2 = inlined_call_operand.vmem [shape: f32[2,8,128], index: 2, kind: output, shape index: {1}]  }
   0x1   :  { %s415_s11 = smov 0  }
   0x2 LB: > { %s25_s12 = sadd.s32 1, %s390_s10  ;;  %p340_p0 = scmp.ge.s32.totalorder %s394_s11, 1  ;;  %s394_s11 = sphi %s415_s11, %s13_s11   ;;  %s390_s10 = sphi %s413_s10, %s455_s10   ;;  %s386_s9 = sphi %s411_s9, %s454_s9  }
   0x3   : > { %p27_p1 = scmp.ge.s32.totalorder %s25_s12, 2  ;;  %p138_p2 = scmp.lt.s32.totalorder %s394_s11, 3 }
   0x5   : > { %s457_s12 = smov (%p27_p1, %s25_s12), 0  ;;  %p139_p3 = pnand %p340_p0, %p138_p2 }
   0x6   : > { %p170_p4 = scmp.lt.s32.totalorder (!%p139_p3), %s386_s9, 1 }
   0x7   : > { %142 = sbr.rel (%p139_p3) target bundleno = 181 (0xb5), region = 24 }
   0xe   : > { %s459_s9 = smov (!%p170_p4, %s386_s9), 1 }
   0xf   : > { %s347_s13 = sshll.u32 %s459_s9, 5  ;;  %s343_s17 = sshll.u32 %s459_s9, 3 }
  0x10   : > { %s177_s16 = scalar_lea.vmem %s451_s0, %s347_s13  ;;  %s183_s20 = scalar_lea.vmem %s452_s1, %s343_s17 }
  0x11   : > { %v191_v0 = vld [vmem:[%s177_s16] sm:$0xff]  ;;  %v192_v1 = vld [vmem:[%s177_s16 + $0x8] sm:$0xff]  ;;  %v193_v5 = vld [vmem:[%s177_s16 + $0x10] sm:$0xff]  ;;  %s189_s23 = scalar_lea.vmem %s453_s2, %s343_s17 }
  0x12   : > { %v195_v2 = vunpack.c.l.bf16 %v191_v0  ;;  %v196_v3 = vunpack.c.h.bf16 %v191_v0  ;;  %v197_v4 = vunpack.c.l.bf16 %v192_v1  ;;  %v198_v6 = vunpack.c.h.bf16 %v192_v1  ;;  %v194_v15 = vld [vmem:[%s177_s16 + $0x18] sm:$0xff] }
  0x13   : > { %v199_v11 = vunpack.c.l.bf16 %v193_v5  ;;  %v200_v16 = vunpack.c.h.bf16 %v193_v5  ;;  %v201_v20 = vunpack.c.l.bf16 %v194_v15  ;;  %v202_v24 = vunpack.c.h.bf16 %v194_v15 }
  0x14   : > { %v203_v7 = vadd.f32 %v196_v3, %v195_v2  ;;  %v212_v8 = vmul.f32 %v195_v2, %v195_v2  ;;  %v213_v9 = vmul.f32 %v196_v3, %v196_v3  ;;  %v214_v10 = vmul.f32 %v197_v4, %v197_v4 }
  0x15   : > { %v215_v13 = vmul.f32 %v198_v6, %v198_v6  ;;  %v216_v18 = vmul.f32 %v199_v11, %v199_v11  ;;  %v217_v22 = vmul.f32 %v200_v16, %v200_v16  ;;  %v218_v26 = vmul.f32 %v201_v20, %v201_v20 }
  0x16   : > { %v204_v12 = vadd.f32 %v203_v7, %v197_v4  ;;  %v220_v14 = vadd.f32 %v213_v9, %v212_v8  ;;  %v219_v29 = vmul.f32 %v202_v24, %v202_v24 }
  0x18   : > { %v205_v17 = vadd.f32 %v204_v12, %v198_v6  ;;  %v221_v19 = vadd.f32 %v220_v14, %v214_v10 }
  0x1a   : > { %v206_v21 = vadd.f32 %v205_v17, %v199_v11  ;;  %v222_v23 = vadd.f32 %v221_v19, %v215_v13 }
  0x1c   : > { %v207_v25 = vadd.f32 %v206_v21, %v200_v16  ;;  %v223_v27 = vadd.f32 %v222_v23, %v216_v18 }
  0x1e   : > { %v208_v28 = vadd.f32 %v207_v25, %v201_v20  ;;  %v224_v30 = vadd.f32 %v223_v27, %v217_v22 }
  0x20   : > { %v209_v31 = vadd.f32 %v208_v28, %v202_v24  ;;  %v225_v32 = vadd.f32 %v224_v30, %v218_v26 }
  0x22   : > { %210 = vadd.xlane.f32.xlu0 %v209_v31  ;;  %v226_v33 = vadd.f32 %v225_v32, %v219_v29 }
  0x26   : > { %227 = vadd.xlane.f32.xlu0 %v226_v33 }
  0xaf   : > { %v211_v34 = vpop.xlane.xlu0 %210 }
  0xb0   : > { %229 = vst [vmem:[%s183_s20] sm:$0xff] %v211_v34 }
  0xb3   : > { %v228_v35 = vpop.xlane.xlu0 %227 }
  0xb4   : > { %230 = vst [vmem:[%s189_s23] sm:$0xff] %v228_v35 }
  0xb5 PF: > { %s13_s11 = sadd.s32 1, %s394_s11   ;;  %s454_s9 = smov %s390_s10 }
  0xb6   : > { %p10_p5 = scmp.ge.s32.totalorder %s13_s11, 4   ;;  %s455_s10 = smov %s457_s12 }
  0xb8   :  { %12 = sbr.rel (!%p10_p5) target bundleno = 2 (0x2), region = 66 }

// kernel: transposed_cbr.5
= control target key start
LH: loop header
LB: loop body
LE: loop exit
PB: predicated region body
PF: predicated region fallthrough
CT: control target
= control target key end

     0   :  { %s437_s12 = smov 0   ;;  %s439_s13 = smov 0   ;;  %s480_s0 = inlined_call_operand.vmem [shape: bf16[2,8,1024], index: 0, kind: input, shape index: {}]   ;;  %s481_s1 = inlined_call_operand.vmem [shape: f32[1,8,1], index: 1, kind: input, shape index: {}]   ;;  %s482_s2 = inlined_call_operand.vmem [shape: f32[1,8,1], index: 2, kind: input, shape index: {}]   ;;  %s483_s3 = inlined_call_operand.vmem [shape: f32[2,8,1024], index: 3, kind: output, shape index: {}]  }
   0x1   :  { %s441_s14 = smov 0  }
   0x2 LB: > { %s25_s15 = sadd.s32 1, %s410_s13  ;;  %p357_p0 = scmp.ge.s32.totalorder %s414_s14, 1  ;;  %s414_s14 = sphi %s441_s14, %s13_s14   ;;  %s410_s13 = sphi %s439_s13, %s485_s13   ;;  %s406_s12 = sphi %s437_s12, %s484_s12  }
   0x3   : > { %p27_p1 = scmp.ge.s32.totalorder %s25_s15, 2  ;;  %p158_p2 = scmp.lt.s32.totalorder %s414_s14, 3 }
   0x5   : > { %s487_s15 = smov (%p27_p1, %s25_s15), 0  ;;  %p159_p3 = pnand %p357_p0, %p158_p2 }
   0x6   : > { %v222_v0 = vld [vmem:[%s481_s1] sm:$0xff] (!%p159_p3)  ;;  %v416_v1 = vmov (!%p159_p3), 0   ;;  %p191_p4 = scmp.lt.s32.totalorder (!%p159_p3), %s406_s12, 1 }
   0x7   : > { %162 = sbr.rel (%p159_p3) target bundleno = 148 (0x94), region = 32  ;;  %391 = vset.pattern.permute.xlu0 (!%p159_p3), %v416_v1  ;;  %v236_v2 = vld [vmem:[%s482_s2] sm:$0xff] (!%p159_p3) }
   0x8   : > { %225 = vperm.xlu0 (!%p159_p3), %391, %v222_v0  }
   0xc   : > { %239 = vperm.xlu0 (!%p159_p3), %391, %v236_v2  }
   0xe   : > { %s489_s12 = smov (!%p191_p4, %s406_s12), 1 }
   0xf   : > { %s364_s20 = sshll.u32 %s489_s12, 5  ;;  %s365_s24 = sshll.u32 %s489_s12, 6 }
  0x10   : > { %s198_s23 = scalar_lea.vmem %s480_s0, %s364_s20  ;;  %s208_s27 = scalar_lea.vmem %s483_s3, %s365_s24 }
  0x11   : > { %v210_v3 = vld [vmem:[%s198_s23] sm:$0xff]  ;;  %v211_v4 = vld [vmem:[%s198_s23 + $0x8] sm:$0xff]  ;;  %v212_v5 = vld [vmem:[%s198_s23 + $0x10] sm:$0xff] }
  0x12   : > { %v213_v6 = vld [vmem:[%s198_s23 + $0x18] sm:$0xff]  ;;  %v214_v7 = vunpack.c.l.bf16 %v210_v3  ;;  %v215_v8 = vunpack.c.h.bf16 %v210_v3  ;;  %v216_v9 = vunpack.c.l.bf16 %v211_v4  ;;  %v217_v10 = vunpack.c.h.bf16 %v211_v4 }
  0x13   : > { %v218_v12 = vunpack.c.l.bf16 %v212_v5  ;;  %v219_v13 = vunpack.c.h.bf16 %v212_v5  ;;  %v220_v14 = vunpack.c.l.bf16 %v213_v6  ;;  %v221_v15 = vunpack.c.h.bf16 %v213_v6 }
  0x87   : > { %v226_v11 = vpop.permute.xlu0 %225 }
  0x88   : > { %v228_v16 = vmul.f32 %v226_v11, %v214_v7  ;;  %v229_v17 = vmul.f32 %v226_v11, %v215_v8  ;;  %v230_v18 = vmul.f32 %v226_v11, %v216_v9  ;;  %v231_v19 = vmul.f32 %v226_v11, %v217_v10 }
  0x89   : > { %v232_v21 = vmul.f32 %v226_v11, %v218_v12  ;;  %v233_v22 = vmul.f32 %v226_v11, %v219_v13  ;;  %v234_v23 = vmul.f32 %v226_v11, %v220_v14  ;;  %v235_v24 = vmul.f32 %v226_v11, %v221_v15 }
  0x8b   : > { %v240_v20 = vpop.permute.xlu0 %239 }
  0x8c   : > { %v242_v25 = vadd.f32 %v240_v20, %v228_v16  ;;  %v243_v26 = vadd.f32 %v240_v20, %v229_v17  ;;  %v244_v27 = vadd.f32 %v240_v20, %v230_v18  ;;  %v245_v28 = vadd.f32 %v240_v20, %v231_v19 }
  0x8d   : > { %v246_v29 = vadd.f32 %v240_v20, %v232_v21  ;;  %v247_v30 = vadd.f32 %v240_v20, %v233_v22  ;;  %v248_v31 = vadd.f32 %v240_v20, %v234_v23  ;;  %v249_v32 = vadd.f32 %v240_v20, %v235_v24 }
  0x8e   : > { %v250_v33 = vmax.f32 %v242_v25, 0.0  ;;  %v251_v34 = vmax.f32 %v243_v26, 0.0  ;;  %v252_v35 = vmax.f32 %v244_v27, 0.0  ;;  %v253_v36 = vmax.f32 %v245_v28, 0.0 }
  0x8f   : > { %v254_v37 = vmax.f32 %v246_v29, 0.0  ;;  %v255_v38 = vmax.f32 %v247_v30, 0.0  ;;  %v256_v39 = vmax.f32 %v248_v31, 0.0  ;;  %v257_v40 = vmax.f32 %v249_v32, 0.0 }
  0x90   : > { %258 = vst [vmem:[%s208_s27] sm:$0xff] %v250_v33  ;;  %259 = vst [vmem:[%s208_s27 + $0x8] sm:$0xff] %v251_v34 }
  0x91   : > { %260 = vst [vmem:[%s208_s27 + $0x10] sm:$0xff] %v252_v35  ;;  %261 = vst [vmem:[%s208_s27 + $0x18] sm:$0xff] %v253_v36 }
  0x92   : > { %262 = vst [vmem:[%s208_s27 + $0x20] sm:$0xff] %v254_v37  ;;  %263 = vst [vmem:[%s208_s27 + $0x28] sm:$0xff] %v255_v38 }
  0x93   : > { %264 = vst [vmem:[%s208_s27 + $0x30] sm:$0xff] %v256_v39  ;;  %265 = vst [vmem:[%s208_s27 + $0x38] sm:$0xff] %v257_v40 }
  0x94 PF: > { %s13_s14 = sadd.s32 1, %s414_s14   ;;  %s484_s12 = smov %s410_s13 }
  0x95   : > { %p10_p5 = scmp.ge.s32.totalorder %s13_s14, 4   ;;  %s485_s13 = smov %s487_s15 }
  0x97   :  { %12 = sbr.rel (!%p10_p5) target bundleno = 2 (0x2), region = 62 }

</bundles_post_ra>
